<compile_context>
chip_gen: v7x
topology: tpu7x:2x2x1
jax: 0.10.0
libtpu: 0.0.40
codegen_flags: <defaults>
</compile_context>

<pallas_src>
import functools

import jax
import jax.numpy as jnp
from jax import lax
from jax.experimental import pallas as pl
from jax.experimental.pallas import tpu as pltpu


# --------------------------------------------------------------------------------------
# Kernels
# --------------------------------------------------------------------------------------

def _combine_kernel(pnum_ref, x_ref, comb_ref):
    """combined = mean(x[:p], 0) + mean(x[p:], 0), one masked pass over x."""
    n = x_ref.shape[0]
    pnum = jnp.clip(pnum_ref[0], 0, n)

    x = x_ref[...]                                                    # (N, H) f32
    rows = lax.broadcasted_iota(jnp.int32, (n, 1), 0)
    pos_sum = jnp.sum(jnp.where(rows < pnum, x, 0.0), axis=0, keepdims=True)  # (1, H)
    total_sum = jnp.sum(x, axis=0, keepdims=True)                             # (1, H)
    neg_sum = total_sum - pos_sum

    pos_cnt = pnum.astype(jnp.float32)
    neg_cnt = (n - pnum).astype(jnp.float32)
    # NaN/inf on an empty group, matching torch.mean over an empty slice.
    comb_ref[...] = pos_sum * (1.0 / pos_cnt) + neg_sum * (1.0 / neg_cnt)


def _gemv_kernel(comb_ref, wt_ref, out_ref):
    """One lane-dense column tile of combined @ W.T (bias added in the wrapper)."""
    lhs = comb_ref[...].astype(jnp.bfloat16)                          # (1, H) bf16 MXU LHS
    out_ref[...] = jnp.dot(lhs, wt_ref[...],
                           preferred_element_type=jnp.float32)        # (1, tn) f32


# --------------------------------------------------------------------------------------
# Planning helpers (VMEM-budgeted tile size, per hardware generation)
# --------------------------------------------------------------------------------------

def _tpu_vmem_capacity():
    try:
        return int(pltpu.get_tpu_info().vmem_capacity_bytes)
    except Exception:
        return 64 << 20  # conservative fallback: v7x per-TensorCore VMEM


def _vmem_limit(est_bytes, cap):
    lim = max(est_bytes + (8 << 20), 16 << 20)
    lim = min(lim, int(cap * 0.7))
    return int(max(lim, est_bytes + (1 << 20)))


def _plan_gemv(h):
    """Largest multiple-of-128 divisor of H whose double-buffered bf16 tile fits budget."""
    cap = _tpu_vmem_capacity()
    wt_budget = int(cap * 0.35)          # for the double-buffered bf16 weight stream
    if h % 128 != 0:
        tn = h                           # full-dim block satisfies the (8,128) rule
    else:
        tn = 128
        t = 128
        while t <= h:
            if h % t == 0 and 2 * h * t * 2 <= wt_budget:
                tn = t
            t += 128
    # Rough per-kernel VMEM estimate: bf16 weight double-buffer + small resident/out bufs.
    est = 2 * h * tn * 2 + 4 * h * 4 + 4 * tn * 4
    return tn, _vmem_limit(est, cap)


# --------------------------------------------------------------------------------------
# Forward wrapper
# --------------------------------------------------------------------------------------

@functools.partial(jax.jit, static_argnames=("tn", "gemv_vmem", "comb_vmem"))
def _c_forward_impl(x, wt_bf16, b, positive_num, *, tn, gemv_vmem, comb_vmem):
    N, H = x.shape

    # Prologue: combined = pos_mean + neg_mean, computed once (not per weight tile).
    combined = pl.pallas_call(
        _combine_kernel,
        out_shape=jax.ShapeDtypeStruct((1, H), jnp.float32),
        grid_spec=pltpu.PrefetchScalarGridSpec(
            num_scalar_prefetch=1,
            grid=(1,),
            in_specs=[pl.BlockSpec((N, H), lambda i, pn: (0, 0))],
            out_specs=pl.BlockSpec((1, H), lambda i, pn: (0, 0)),
        ),
        compiler_params=pltpu.CompilerParams(
            dimension_semantics=("arbitrary",),
            vmem_limit_bytes=comb_vmem,
        ),
        cost_estimate=pl.CostEstimate(
            flops=4 * N * H, transcendentals=0, bytes_accessed=4 * (N * H + H)),
    )(positive_num, x)

    # Main GEMV: stream bf16 W.T in lane-dense column tiles, combined stays resident.
    grid_n = H // tn
    gemv = pl.pallas_call(
        _gemv_kernel,
        out_shape=jax.ShapeDtypeStruct((1, H), jnp.float32),
        grid=(grid_n,),
        in_specs=[
            pl.BlockSpec((1, H), lambda j: (0, 0)),     # combined: resident, DMA'd once
            pl.BlockSpec((H, tn), lambda j: (0, j)),    # bf16 W.T: streamed column tiles
        ],
        out_specs=pl.BlockSpec((1, tn), lambda j: (0, j)),
        compiler_params=pltpu.CompilerParams(
            dimension_semantics=("parallel",),
            vmem_limit_bytes=gemv_vmem,
        ),
        cost_estimate=pl.CostEstimate(
            flops=2 * H * H, transcendentals=0, bytes_accessed=2 * H * H + 12 * H),
    )(combined, wt_bf16)

    # positive_C applied to both means -> bias contributes 2*b, added once here.
    twob = (2.0 * b.astype(jnp.float32)).reshape(1, H)
    return gemv + twob


def c_forward(x, wt, b, positive_num):
    """x: (N, H) f32; wt: (H, H) = W.T (ideally pre-cast to bf16); b: (H,) or (1, H);
    positive_num: int32 array of shape (1,)."""
    _, H = x.shape
    N = x.shape[0]
    tn, gemv_vmem = _plan_gemv(H)
    cap = _tpu_vmem_capacity()
    comb_vmem = _vmem_limit(2 * N * H * 4 + 4 * H * 4, cap)
    if wt.dtype != jnp.bfloat16:
        wt = wt.astype(jnp.bfloat16)   # callers should pre-cast once for repeated use
    return _c_forward_impl(x, wt, b, positive_num,
                           tn=tn, gemv_vmem=gemv_vmem, comb_vmem=comb_vmem)


def _reference(x, wt_f32, b2d, positive_num):
    pn = int(positive_num)
    pos_mean = jnp.mean(x[:pn], axis=0, keepdims=True)
    neg_mean = jnp.mean(x[pn:], axis=0, keepdims=True)
    return (pos_mean @ wt_f32 + b2d) + (neg_mean @ wt_f32 + b2d)


if __name__ == "__main__":
    h_size = 256          # hidden size (multiple of 128 -> lane-dense tiles)
    n_rows = 16           # positive_num + negative_num
    positive_num = 5

    key = jax.random.PRNGKey(0)
    kx, kw, kb = jax.random.split(key, 3)

    x = jax.random.normal(kx, (n_rows, h_size), dtype=jnp.float32)

    # Deterministic init of positive_C (PyTorch Linear: W (out,in), b (out,))
    bound = 1.0 / (h_size ** 0.5)
    W = jax.random.uniform(kw, (h_size, h_size), jnp.float32, -bound, bound)
    b = jax.random.uniform(kb, (h_size,), jnp.float32, -bound, bound)

    wt_f32 = W.T                            # (in, out) so that y = mean @ wt + b
    wt_bf16 = wt_f32.astype(jnp.bfloat16)   # pre-cast once: weights are static across calls
    pnum_arr = jnp.array([positive_num], dtype=jnp.int32)

    out = c_forward(x, wt_bf16, b, pnum_arr)
    out = jax.block_until_ready(out)

    ref = _reference(x, wt_f32, b.reshape(1, -1), positive_num)
    assert out.shape == (1, h_size)
    assert not bool(jnp.any(jnp.isnan(out)))
    # bf16 weight stream -> compare against f32 reference with bf16-appropriate tolerance.
    assert bool(jnp.allclose(out, ref, atol=2e-2, rtol=2e-2)), (out, ref)

    print("KERNEL_OK")
</pallas_src>

<mosaic_0001>
module attributes {stable_mosaic.version = 11 : i64} {
  func.func @_combine_kernel(%arg0: i32, %arg1: memref<1xi32, #tpu.memory_space<smem>>, %arg2: memref<16x256xf32, #tpu.memory_space<vmem>>, %arg3: memref<1x256xf32, #tpu.memory_space<vmem>>) attributes {dimension_semantics = [#tpu.dimension_semantics<arbitrary>], iteration_bounds = array<i64: 1>, scalar_prefetch = 1 : i64, scratch_operands = 0 : i64, tpu.core_type = #tpu.core_type<tc>, window_params = [{pipeline_mode = #tpu.pipeline_mode<synchronous>, transform_indices = @transform_0, window_bounds = array<i64: 16, 256>}, {pipeline_mode = #tpu.pipeline_mode<synchronous>, transform_indices = @transform_1, window_bounds = array<i64: 1, 256>}]} {
    %c0 = arith.constant 0 : index
    %0 = memref.load %arg1[%c0] : memref<1xi32, #tpu.memory_space<smem>>
    %c0_i32 = arith.constant 0 : i32
    %c16_i32 = arith.constant 16 : i32
    %1 = arith.maxsi %c0_i32, %0 : i32
    %2 = arith.minsi %c16_i32, %1 : i32
    %c0_0 = arith.constant 0 : index
    %c0_1 = arith.constant 0 : index
    %3 = vector.load %arg2[%c0_0, %c0_1] : memref<16x256xf32, #tpu.memory_space<vmem>>, vector<16x256xf32>
    %4 = tpu.iota {dimensions = array<i32: 0>} : vector<16x1xi32>
    %5 = vector.broadcast %2 : i32 to vector<16x1xi32>
    %6 = arith.cmpi slt, %4, %5 : vector<16x1xi32>
    %cst = arith.constant 0.000000e+00 : f32
    %7 = vector.shape_cast %6 : vector<16x1xi1> to vector<16x1xi1>
    %8 = vector.broadcast %7 : vector<16x1xi1> to vector<16x256xi1>
    %9 = vector.broadcast %cst : f32 to vector<16x256xf32>
    %10 = arith.select %8, %3, %9 : vector<16x256xi1>, vector<16x256xf32>
    %cst_2 = arith.constant dense<0.000000e+00> : vector<256xf32>
    %11 = vector.multi_reduction <add>, %10, %cst_2 [0] : vector<16x256xf32> to vector<256xf32>
    %12 = vector.shape_cast %11 : vector<256xf32> to vector<1x256xf32>
    %cst_3 = arith.constant dense<0.000000e+00> : vector<256xf32>
    %13 = vector.multi_reduction <add>, %3, %cst_3 [0] : vector<16x256xf32> to vector<256xf32>
    %14 = vector.shape_cast %13 : vector<256xf32> to vector<1x256xf32>
    %15 = arith.subf %14, %12 : vector<1x256xf32>
    %16 = arith.sitofp %2 : i32 to f32
    %c16_i32_4 = arith.constant 16 : i32
    %17 = arith.subi %c16_i32_4, %2 : i32
    %18 = arith.sitofp %17 : i32 to f32
    %cst_5 = arith.constant 1.000000e+00 : f32
    %19 = arith.divf %cst_5, %16 : f32
    %20 = vector.broadcast %19 : f32 to vector<1x256xf32>
    %21 = arith.mulf %12, %20 : vector<1x256xf32>
    %cst_6 = arith.constant 1.000000e+00 : f32
    %22 = arith.divf %cst_6, %18 : f32
    %23 = vector.broadcast %22 : f32 to vector<1x256xf32>
    %24 = arith.mulf %15, %23 : vector<1x256xf32>
    %25 = arith.addf %21, %24 : vector<1x256xf32>
    %c0_7 = arith.constant 0 : index
    %c0_8 = arith.constant 0 : index
    %26 = vector.load %arg3[%c0_7, %c0_8] : memref<1x256xf32, #tpu.memory_space<vmem>>, vector<1x256xf32>
    tpu.vector_store %arg3[%c0_7, %c0_8], %25 {strides = array<i32>} : memref<1x256xf32, #tpu.memory_space<vmem>>, vector<1x256xf32>,
    return
  }
  func.func @transform_0(%arg0: i32, %arg1: memref<1xi32, #tpu.memory_space<smem>>) -> (i32, i32) {
    %c0_i32 = arith.constant 0 : i32
    %c0_i32_0 = arith.constant 0 : i32
    %c0_i32_1 = arith.constant 0 : i32
    return %c0_i32, %c0_i32_0 : i32, i32
  }
  func.func @transform_1(%arg0: i32, %arg1: memref<1xi32, #tpu.memory_space<smem>>) -> (i32, i32) {
    %c0_i32 = arith.constant 0 : i32
    %c0_i32_0 = arith.constant 0 : i32
    %c0_i32_1 = arith.constant 0 : i32
    return %c0_i32, %c0_i32_0 : i32, i32
  }
}

module attributes {stable_mosaic.version = 11 : i64} {
  func.func @_gemv_kernel(%arg0: i32, %arg1: memref<1x256xf32, #tpu.memory_space<vmem>>, %arg2: memref<256x256xbf16, #tpu.memory_space<vmem>>, %arg3: memref<1x256xf32, #tpu.memory_space<vmem>>) attributes {dimension_semantics = [#tpu.dimension_semantics<parallel>], iteration_bounds = array<i64: 1>, scalar_prefetch = 0 : i64, scratch_operands = 0 : i64, tpu.core_type = #tpu.core_type<tc>, window_params = [{pipeline_mode = #tpu.pipeline_mode<synchronous>, transform_indices = @transform_0, window_bounds = array<i64: 1, 256>}, {transform_indices = @transform_1, window_bounds = array<i64: 256, 256>}, {transform_indices = @transform_2, window_bounds = array<i64: 1, 256>}]} {
    %c0 = arith.constant 0 : index
    %c0_0 = arith.constant 0 : index
    %0 = vector.load %arg1[%c0, %c0_0] : memref<1x256xf32, #tpu.memory_space<vmem>>, vector<1x256xf32>
    %1 = arith.truncf %0 : vector<1x256xf32> to vector<1x256xbf16>
    %c0_1 = arith.constant 0 : index
    %c0_2 = arith.constant 0 : index
    %2 = vector.load %arg2[%c0_1, %c0_2] : memref<256x256xbf16, #tpu.memory_space<vmem>>, vector<256x256xbf16>
    %cst = arith.constant dense<0.000000e+00> : vector<1x256xf32>
    %3 = tpu.matmul %1, %2, %cst {dimension_numbers = #tpu.dot_dimension_numbers<[1], [0], [0], [1], [0, 0, 1, 1], [], []>} : vector<1x256xbf16>, vector<256x256xbf16>, vector<1x256xf32> -> vector<1x256xf32>
    %c0_3 = arith.constant 0 : index
    %c0_4 = arith.constant 0 : index
    %4 = vector.load %arg3[%c0_3, %c0_4] : memref<1x256xf32, #tpu.memory_space<vmem>>, vector<1x256xf32>
    tpu.vector_store %arg3[%c0_3, %c0_4], %3 {strides = array<i32>} : memref<1x256xf32, #tpu.memory_space<vmem>>, vector<1x256xf32>,
    return
  }
  func.func @transform_0(%arg0: i32) -> (i32, i32) {
    %c0_i32 = arith.constant 0 : i32
    %c0_i32_0 = arith.constant 0 : i32
    %c0_i32_1 = arith.constant 0 : i32
    return %c0_i32, %c0_i32_0 : i32, i32
  }
  func.func @transform_1(%arg0: i32) -> (i32, i32) {
    %c0_i32 = arith.constant 0 : i32
    %c0_i32_0 = arith.constant 0 : i32
    return %c0_i32, %arg0 : i32, i32
  }
  func.func @transform_2(%arg0: i32) -> (i32, i32) {
    %c0_i32 = arith.constant 0 : i32
    %c0_i32_0 = arith.constant 0 : i32
    return %c0_i32, %arg0 : i32, i32
  }
}

</mosaic_0001>

<bundles_post_ra>
// kernel: _c_forward_impl.2
= control target key start
LH: loop header
LB: loop body
LE: loop exit
PB: predicated region body
PF: predicated region fallthrough
CT: control target
= control target key end

     0   :  { %8 = vsyncpa [#allocation5], 0  ;;  %s165_s9 = smov [#allocation4]   ;;  %s208_s0 = inlined_call_operand.<no memory space> [shape: s32[1], index: 0, kind: input, shape index: {}]   ;;  %s209_s1 = inlined_call_operand.hbm [shape: f32[16,256], index: 1, kind: input, shape index: {}]   ;;  %s210_s2 = inlined_call_operand.vmem [shape: f32[1,256], index: 2, kind: output, shape index: {}]  }
   0x1   :  { %s14_s10 = sshll.u32 %s165_s9, 4  ;;  %s141_s13 = scalar_lea.hbm %s209_s1, 512  ;;  %s15_s10 = int_to_ptr.vmem [resolvable:$true] %s14_s10 }
   0x2   :  { %p142_p0 = scmp.ne.s32.totalorder %s209_s1, %s141_s13  ;;  %p145_p1 = scmp.lt.u32.totalorder %s141_s13, %s209_s1 }
   0x4   :  { %p147_p2 = pnand %p145_p1, %p142_p0 }
   0x6   :  { %150 = shalt.err (!%p147_p2)
}
   0x7   :  { %s151_s18 = scalar_lea.vmem %s15_s10, 512  ;;  %p156_p4 = scmp.lt.s32.totalorder %s15_s10, %s15_s10 }
   0x8   :  { %p152_p3 = scmp.ne.s32.totalorder %s15_s10, %s151_s18  ;;  %p157_p5 = scmp.lt.s32.totalorder %s151_s18, %s151_s18 }
   0xa   :  { %p158_p6 = por %p157_p5, %p156_p4 }
   0xc   :  { %p159_p7 = pnand %p158_p6, %p152_p3 }
   0xe   :  { %162 = shalt.err (!%p159_p7)
}
   0xf   :  { %s166_s19 = smov 256   ;;  %s167_s20 = smov 16  }
  0x10   :  { %20 = dma.hbm_to_vmem [thread:$0]  %s209_s1, 512, %s15_s10, [#allocation5], %s166_s19, %s166_s19, %s167_s20  }
  0x11   :  { %p25_p8 = scmp.gt.s32.totalorder %s208_s0, 0  ;;  %p122_p9 = scmp.lt.s32.totalorder %s208_s0, 16 }
  0x12   :  { %163 = dma.done.wait [#allocation5], 512  }
  0x13   :  { %164 = vsyncadd [#allocation5], 4294966784  ;;  %s212_s0 = smov (!%p25_p8, %s208_s0), 0  ;;  %v33_v4 = vlaneseq  ;;  %v29_v8 = vld [vmem:[#allocation4] sm:$0xff]  ;;  %v30_v9 = vld [vmem:[#allocation4 + $0x8] sm:$0xff] }
  0x14   :  { %s214_s0 = smov (!%p122_p9, %s212_s0), 16  ;;  %v31_v10 = vld [vmem:[#allocation4 + $0x10] sm:$0xff]  ;;  %v32_v11 = vld [vmem:[#allocation4 + $0x18] sm:$0xff]  ;;  %v168_v44 = vmov 1966171168  }
  0x15   :  { %s77_s29 = scvt.s32.f32 %s214_s0  ;;  %s78_s30 = ssub.s32 16, %s214_s0  ;;  %v34_v5 = vshrl.u32 %v33_v4, 7  ;;  %v36_v7 = vstv %s214_s0  ;;  %v61_v18 = vadd.f32 %v31_v10, %v29_v8  ;;  %v68_v19 = vadd.f32 %v32_v11, %v30_v9 }
  0x16   :  { %s79_s3 = scvt.s32.f32 %s78_s30  ;;  %v98_v45 = vunpack.c.l.s4 %v168_v44  ;;  %vm114_vm2 = vcmp.lt.s32.totalorder %v33_v4, 256 }
  0x17   :  { %v80_v0 = vstv %s77_s29  ;;  %v35_v6 = vadd.s32 8, %v34_v5  ;;  %vm37_vm0 = vcmp.lt.s32.totalorder %v34_v5, %v36_v7  ;;  %v62_v22 = vrot.slane %v61_v18, 4 }
  0x18   :  { %137 = vrcp.f32 %v80_v0  ;;  %v86_v1 = vstv %s79_s3  ;;  %v43_v12 = vsel %vm37_vm0, %v29_v8, 0.0  ;;  %v44_v13 = vsel %vm37_vm0, %v30_v9, 0.0 }
  0x19   :  { %139 = vrcp.f32 %v86_v1  ;;  %vm38_vm1 = vcmp.lt.s32.totalorder %v35_v6, %v36_v7  ;;  %v69_v23 = vrot.slane %v68_v19, 4  ;;  %v63_v26 = vadd.f32 %v62_v22, %v61_v18 }
  0x1a   :  { %v45_v14 = vsel %vm38_vm1, %v31_v10, 0.0  ;;  %v46_v15 = vsel %vm38_vm1, %v32_v11, 0.0  ;;  %v99_v49 = vunpack.c.0.s8 %v98_v45 }
  0x1b   :  { %v47_v16 = vadd.f32 %v45_v14, %v43_v12  ;;  %v54_v17 = vadd.f32 %v46_v15, %v44_v13  ;;  %v70_v27 = vadd.f32 %v69_v23, %v68_v19  ;;  %v64_v30 = vrot.slane %v63_v26, 2 }
  0x1c   :  { %v102_v57 = vsub.s32 %v99_v49, %v34_v5 }
  0x1d   :  { %v48_v20 = vrot.slane %v47_v16, 4  ;;  %v55_v21 = vrot.slane %v54_v17, 4  ;;  %v71_v31 = vrot.slane %v70_v27, 2  ;;  %v65_v34 = vadd.f32 %v64_v30, %v63_v26 }
  0x1f   :  { %v49_v24 = vadd.f32 %v48_v20, %v47_v16  ;;  %v56_v25 = vadd.f32 %v55_v21, %v54_v17  ;;  %v72_v35 = vadd.f32 %v71_v31, %v70_v27  ;;  %v66_v38 = vrot.slane %v65_v34, 1 }
  0x21   :  { %v50_v28 = vrot.slane %v49_v24, 2  ;;  %v57_v29 = vrot.slane %v56_v25, 2  ;;  %v73_v39 = vrot.slane %v72_v35, 1  ;;  %v67_v42 = vadd.f32 %v66_v38, %v65_v34 }
  0x22   :  { %v138_v2 = vpop.eup %137 }
  0x23   :  { %v140_v3 = vpop.eup %139  ;;  %129 = vpush %v138_v2  ;;  %v51_v32 = vadd.f32 %v50_v28, %v49_v24  ;;  %v58_v33 = vadd.f32 %v57_v29, %v56_v25  ;;  %v74_v43 = vadd.f32 %v73_v39, %v72_v35 }
  0x24   :  { %131 = vpush %v140_v3 }
  0x25   :  { %v52_v36 = vrot.slane %v51_v32, 1  ;;  %v59_v37 = vrot.slane %v58_v33, 1 }
  0x27   :  { %v53_v40 = vadd.f32 %v52_v36, %v51_v32  ;;  %v60_v41 = vadd.f32 %v59_v37, %v58_v33 }
  0x29   :  { %v75_v46 = vsub.f32 %v67_v42, %v53_v40  ;;  %v76_v47 = vsub.f32 %v74_v43, %v60_v41 }
  0x54   :  { %s130_s0 = spop %129 }
  0x55   :  { %v83_v48 = vstv %s130_s0  ;;  %s132_s1 = spop %131 }
  0x56   :  { %v84_v50 = vmul.f32 %v83_v48, %v53_v40  ;;  %v85_v51 = vmul.f32 %v83_v48, %v60_v41  ;;  %v89_v52 = vstv %s132_s1 }
  0x57   :  { %v90_v53 = vmul.f32 %v89_v52, %v75_v46  ;;  %v91_v54 = vmul.f32 %v89_v52, %v76_v47 }
  0x59   :  { %v92_v55 = vadd.f32 %v90_v53, %v84_v50  ;;  %v93_v56 = vadd.f32 %v91_v54, %v85_v51 }
  0x5b   :  { %v96_v58 = vcombine.low %v92_v55, %v93_v56 }
  0x5d   :  { %v103_v59 = vrot.slane %v96_v58, %v102_v57 }
  0x5f   :  { %v110_v60 = vrot.slane %v103_v59, %v102_v57 }
  0x61   :  { %116 = vst.msk [vmem:[%s210_s2] sm:$0x3] %vm114_vm2, %v110_v60 }
  0x62   :  { %121 = vsyncpa [#allocation5], 1 }

// kernel: _c_forward_impl.3
= control target key start
LH: loop header
LB: loop body
LE: loop exit
PB: predicated region body
PF: predicated region fallthrough
CT: control target
= control target key end

     0   :  { %7 = vsyncpa [#allocation3], 0  ;;  %s408_s9 = smov [#allocation2]   ;;  %s447_s0 = inlined_call_operand.vmem [shape: f32[1,256], index: 0, kind: input, shape index: {}]   ;;  %s448_s1 = inlined_call_operand.hbm [shape: bf16[256,256], index: 1, kind: input, shape index: {}]   ;;  %s449_s2 = inlined_call_operand.vmem [shape: f32[1,256], index: 2, kind: output, shape index: {}]  }
   0x1   :  { %s15_s10 = sshll.u32 %s408_s9, 4  ;;  %s384_s13 = scalar_lea.hbm %s448_s1, 4096  ;;  %s16_s10 = int_to_ptr.vmem [resolvable:$true] %s15_s10 }
   0x2   :  { %p385_p0 = scmp.ne.s32.totalorder %s448_s1, %s384_s13  ;;  %p388_p1 = scmp.lt.u32.totalorder %s384_s13, %s448_s1 }
   0x4   :  { %p390_p2 = pnand %p388_p1, %p385_p0 }
   0x6   :  { %393 = shalt.err (!%p390_p2)
}
   0x7   :  { %s394_s18 = scalar_lea.vmem %s16_s10, 4096  ;;  %p399_p4 = scmp.lt.s32.totalorder %s16_s10, %s16_s10 }
   0x8   :  { %p395_p3 = scmp.ne.s32.totalorder %s16_s10, %s394_s18  ;;  %p400_p5 = scmp.lt.s32.totalorder %s394_s18, %s394_s18 }
   0xa   :  { %p401_p6 = por %p400_p5, %p399_p4 }
   0xc   :  { %p402_p7 = pnand %p401_p6, %p395_p3 }
   0xe   :  { %405 = shalt.err (!%p402_p7)
}
   0xf   :  { %s409_s19 = smov 128   ;;  %s410_s20 = smov 8  }
  0x10   :  { %21 = dma.hbm_to_vmem [thread:$0]  %s448_s1, 4096, %s16_s10, [#allocation3], %s409_s19, %s409_s19, %s410_s20  }
  0x11   :  { %406 = dma.done.wait [#allocation3], 4096  }
  0x12   :  { %407 = vsyncadd [#allocation3], 4294963200  ;;  %v336_v0 = vld [vmem:[#allocation2 + $0x4] ss:$8 sps:$4 sm:$0xff]   ;;  %v338_v1 = vld [vmem:[#allocation2] ss:$8 sps:$4 sm:$0xff]   ;;  %v27_v7 = vlaneseq }
  0x13   :  { %231 = vmatprep.subr.bf16.mxu0 %v336_v0  ;;  %v339_v2 = vld [vmem:[#allocation2 + $0x14] ss:$8 sps:$4 sm:$0xff]   ;;  %v341_v3 = vld [vmem:[#allocation2 + $0x10] ss:$8 sps:$4 sm:$0xff]   ;;  %v342_v4 = vld [vmem:[#allocation2 + $0x24] ss:$8 sps:$4 sm:$0xff]  }
  0x14   :  { %232 = vmatpush1.bf16.msra.mxu0 %v338_v1  ;;  %v344_v5 = vld [vmem:[#allocation2 + $0x20] ss:$8 sps:$4 sm:$0xff]   ;;  %v345_v6 = vld [vmem:[#allocation2 + $0x34] ss:$8 sps:$4 sm:$0xff]   ;;  %v347_v8 = vld [vmem:[#allocation2 + $0x30] ss:$8 sps:$4 sm:$0xff]  }
  0x15   :  { %233 = vmatprep.subr.bf16.mxu0 %v339_v2  ;;  %v348_v9 = vld [vmem:[#allocation2 + $0x44] ss:$8 sps:$4 sm:$0xff]   ;;  %v28_v10 = vshrl.u32 %v27_v7, 7  ;;  %v350_v11 = vld [vmem:[#allocation2 + $0x40] ss:$8 sps:$4 sm:$0xff]   ;;  %vm292_vm0 = vcmp.lt.s32.totalorder %v27_v7, 256 }
  0x16   :  { %v351_v12 = vld [vmem:[#allocation2 + $0x54] ss:$8 sps:$4 sm:$0xff]   ;;  %v353_v14 = vld [vmem:[#allocation2 + $0x50] ss:$8 sps:$4 sm:$0xff]   ;;  %v354_v15 = vld [vmem:[#allocation2 + $0x64] ss:$8 sps:$4 sm:$0xff]  }
  0x17   :  { %v33_v13 = vsub.s32 1, %v28_v10  ;;  %v25_v16 = vld [vmem:[%s447_s0] sm:$0x3]  ;;  %v357_v19 = vld [vmem:[#allocation2 + $0x74] ss:$8 sps:$4 sm:$0xff]   ;;  %v29_v35 = vsub.s32 0, %v28_v10 }
  0x18   :  { %234 = vmatpush1.bf16.msra.mxu0 %v341_v3  ;;  %v356_v18 = vld [vmem:[#allocation2 + $0x60] ss:$8 sps:$4 sm:$0xff]   ;;  %v359_v21 = vld [vmem:[#allocation2 + $0x70] ss:$8 sps:$4 sm:$0xff]   ;;  %v360_v22 = vld [vmem:[#allocation2 + $0x84] ss:$8 sps:$4 sm:$0xff]  }
  0x19   :  { %235 = vmatprep.subr.bf16.mxu0 %v342_v4  ;;  %v34_v17 = vrot.slane %v25_v16, %v33_v13  ;;  %v362_v23 = vld [vmem:[#allocation2 + $0x80] ss:$8 sps:$4 sm:$0xff]   ;;  %v363_v24 = vld [vmem:[#allocation2 + $0x94] ss:$8 sps:$4 sm:$0xff]   ;;  %v365_v25 = vld [vmem:[#allocation2 + $0x90] ss:$8 sps:$4 sm:$0xff]   ;;  %v30_v38 = vrot.slane %v25_v16, %v29_v35 }
  0x1a   :  { %v366_v26 = vld [vmem:[#allocation2 + $0xa4] ss:$8 sps:$4 sm:$0xff]   ;;  %v368_v27 = vld [vmem:[#allocation2 + $0xa0] ss:$8 sps:$4 sm:$0xff]   ;;  %v369_v28 = vld [vmem:[#allocation2 + $0xb4] ss:$8 sps:$4 sm:$0xff]  }
  0x1b   :  { %v38_v20 = vpack.c.bf16 %v34_v17, %v34_v17  ;;  %v371_v29 = vld [vmem:[#allocation2 + $0xb0] ss:$8 sps:$4 sm:$0xff]   ;;  %v372_v30 = vld [vmem:[#allocation2 + $0xc4] ss:$8 sps:$4 sm:$0xff]   ;;  %v374_v31 = vld [vmem:[#allocation2 + $0xc0] ss:$8 sps:$4 sm:$0xff]   ;;  %v37_v40 = vpack.c.bf16 %v30_v38, %v30_v38 }
  0x1c   :  { %236 = vmatpush1.bf16.msra.mxu0 %v344_v5  ;;  %v375_v32 = vld [vmem:[#allocation2 + $0xd4] ss:$8 sps:$4 sm:$0xff]   ;;  %v377_v33 = vld [vmem:[#allocation2 + $0xd0] ss:$8 sps:$4 sm:$0xff]   ;;  %v378_v34 = vld [vmem:[#allocation2 + $0xe4] ss:$8 sps:$4 sm:$0xff]  }
  0x1d   :  { %237 = vmatprep.subr.bf16.mxu0 %v345_v6  ;;  %263 = vmatprep.mubr.bf16.mxu0 %v38_v20  ;;  %v380_v36 = vld [vmem:[#allocation2 + $0xe0] ss:$8 sps:$4 sm:$0xff]   ;;  %v381_v37 = vld [vmem:[#allocation2 + $0xf4] ss:$8 sps:$4 sm:$0xff]   ;;  %v383_v39 = vld [vmem:[#allocation2 + $0xf0] ss:$8 sps:$4 sm:$0xff]  }
  0x1e   :  { %v411_v41 = vmov 1966171168  }
  0x1f   :  { %v276_v42 = vunpack.c.l.s4 %v411_v41 }
  0x20   :  { %238 = vmatpush1.bf16.msra.mxu0 %v347_v8 }
  0x21   :  { %239 = vmatprep.subr.bf16.mxu0 %v348_v9  ;;  %v277_v43 = vunpack.c.0.s8 %v276_v42 }
  0x23   :  { %v280_v45 = vsub.s32 %v277_v43, %v28_v10 }
  0x24   :  { %240 = vmatpush1.bf16.msra.mxu0 %v350_v11 }
  0x25   :  { %241 = vmatprep.subr.bf16.mxu0 %v351_v12 }
  0x28   :  { %242 = vmatpush1.bf16.msra.mxu0 %v353_v14 }
  0x29   :  { %243 = vmatprep.subr.bf16.mxu0 %v354_v15 }
  0x2c   :  { %244 = vmatpush1.bf16.msra.mxu0 %v356_v18 }
  0x2d   :  { %245 = vmatprep.subr.bf16.mxu0 %v357_v19 }
  0x30   :  { %246 = vmatpush1.bf16.msra.mxu0 %v359_v21 }
  0x31   :  { %247 = vmatprep.subr.bf16.mxu0 %v360_v22 }
  0x34   :  { %248 = vmatpush1.bf16.msra.mxu0 %v362_v23 }
  0x35   :  { %249 = vmatprep.subr.bf16.mxu0 %v363_v24 }
  0x38   :  { %250 = vmatpush1.bf16.msra.mxu0 %v365_v25 }
  0x39   :  { %251 = vmatprep.subr.bf16.mxu0 %v366_v26 }
  0x3c   :  { %252 = vmatpush1.bf16.msra.mxu0 %v368_v27 }
  0x3d   :  { %253 = vmatprep.subr.bf16.mxu0 %v369_v28 }
  0x40   :  { %254 = vmatpush1.bf16.msra.mxu0 %v371_v29 }
  0x41   :  { %255 = vmatprep.subr.bf16.mxu0 %v372_v30 }
  0x44   :  { %256 = vmatpush1.bf16.msra.mxu0 %v374_v31 }
  0x45   :  { %257 = vmatprep.subr.bf16.mxu0 %v375_v32 }
  0x48   :  { %258 = vmatpush1.bf16.msra.mxu0 %v377_v33 }
  0x49   :  { %259 = vmatprep.subr.bf16.mxu0 %v378_v34 }
  0x4c   :  { %260 = vmatpush1.bf16.msra.mxu0 %v380_v36 }
  0x4d   :  { %261 = vmatprep.subr.bf16.mxu0 %v381_v37 }
  0x50   :  { %262 = vmatpush1.bf16.msra.mxu0 %v383_v39 }
  0x53   :  { %264 = vmatmul.mubr.bf16.vlgmr.msra.gmra.mrb[0].mxu0 %v37_v40 }
 0x126   :  { %v265_v44 = vpop.f32.mrb[0].mxu0 }
 0x127   :  { %v267_v46 = vpop.f32.mrb[1].mxu0 }
 0x128   :  { %v274_v47 = vcombine.low %v265_v44, %v267_v46  ;;  %v269_v48 = vpop.f32.mrb[2].mxu0 }
 0x129   :  { %v270_v49 = vpop.f32.mrb[3].mxu0 }
 0x12a   :  { %v281_v50 = vrot.slane %v274_v47, %v280_v45 }
 0x12c   :  { %v288_v51 = vrot.slane %v281_v50, %v280_v45 }
 0x12e   :  { %294 = vst.msk [vmem:[%s449_s2] sm:$0x3] %vm292_vm0, %v288_v51 }
 0x12f   :  { %299 = vsyncpa [#allocation3], 1 }

</bundles_post_ra>
